<compile_context>
chip_gen: v7x
topology: tpu7x:2x2x1
jax: 0.10.0
libtpu: 0.0.40
codegen_flags: <defaults>
</compile_context>

<pallas_src>
import math

import jax
import jax.numpy as jnp
from jax.experimental import pallas as pl
from jax.experimental.pallas import tpu as pltpu


# ---------------------------------------------------------------------------
# Helpers
# ---------------------------------------------------------------------------
def _vmem_budget_bytes():
    """~75% of physical VMEM (48 MiB v7x, capped at 96 MiB on v5e/v6e)."""
    try:
        cap = int(pltpu.get_tpu_info().vmem_capacity_bytes)
    except Exception:
        cap = 128 * 2**20
    return int(min(cap - cap // 4, 96 * 2**20))


def _largest_divisor_tile(dim, cap, align):
    """Largest t <= cap with t % align == 0 and dim % t == 0; else full dim."""
    if dim <= cap:
        return dim
    t = (min(cap, dim) // align) * align
    while t >= align:
        if dim % t == 0:
            return t
        t -= align
    # No aligned divisor <= cap: fall back to the full extent (keeps the
    # kernel pad-free; pathological for huge prime-ish dims only).
    return dim


def _select_tiles(M, I, O, x_item, w_item, out_item, budget):
    """Pick (TM, TK, TN) aligned divisors within a rough VMEM-share budget."""
    TN = _largest_divisor_tile(O, 512, 128)                       # lane-dense
    tk_cap = (int(0.40 * budget) // (2 * w_item * TN)) // 128 * 128
    TK = _largest_divisor_tile(I, min(2048, max(128, tk_cap)), 128)
    tm_cap_x = int(0.25 * budget) // (2 * x_item * TK)
    tm_cap_o = int(0.35 * budget) // (TN * (2 * out_item + 4))
    tm_cap = max(8, (min(tm_cap_x, tm_cap_o) // 8) * 8)
    TM = _largest_divisor_tile(M, min(1024, tm_cap), 8)
    return TM, TK, TN


# ---------------------------------------------------------------------------
# Path 1: folded single-step kernels (small problems, no grid).
# ---------------------------------------------------------------------------
def _make_folded_kernel_jmo(compute_dtype):
    def kernel(x_ref, w_ref, b_ref, o_ref):
        # x (J,M,I)  w (J,I,O)  b (J,O)  o (J,M,O); per-j immediate store
        # bounds live ranges (no J simultaneous accumulators / no concat).
        for j in range(x_ref.shape[0]):
            x = x_ref[j]
            if compute_dtype is not None:
                x = x.astype(compute_dtype)
            acc = jnp.dot(x, w_ref[j], preferred_element_type=jnp.float32)
            o_ref[j] = (acc + b_ref[pl.ds(j, 1), :]
                        .astype(jnp.float32)).astype(o_ref.dtype)
    return kernel


def _make_folded_kernel_slab(compute_dtype):
    def kernel(x_ref, w_ref, b_ref, o_ref):
        # Narrow O (<128): single lane-dense (M, J*O) store avoids masked vst.
        cols = []
        for j in range(x_ref.shape[0]):
            x = x_ref[j]
            if compute_dtype is not None:
                x = x.astype(compute_dtype)
            acc = jnp.dot(x, w_ref[j], preferred_element_type=jnp.float32)
            cols.append(acc + b_ref[pl.ds(j, 1), :].astype(jnp.float32))
        o_ref[...] = jnp.concatenate(cols, axis=-1).astype(o_ref.dtype)
    return kernel


def _forward_folded(x3, weight, bias, out_dtype, compute_dtype, vmem_budget):
    J, M, I = x3.shape
    O = weight.shape[-1]
    out_item = jnp.dtype(out_dtype).itemsize
    ce = pl.CostEstimate(
        flops=2 * J * M * I * O,
        transcendentals=0,
        bytes_accessed=(x3.size * jnp.dtype(x3.dtype).itemsize
                        + weight.size * jnp.dtype(weight.dtype).itemsize
                        + bias.size * jnp.dtype(bias.dtype).itemsize
                        + J * M * O * out_item))
    params = pltpu.CompilerParams(
        vmem_limit_bytes=int(min(vmem_budget, 32 * 2**20)))

    if O >= 128:
        out3 = pl.pallas_call(
            _make_folded_kernel_jmo(compute_dtype),
            out_shape=jax.ShapeDtypeStruct((J, M, O), out_dtype),
            compiler_params=params,
            cost_estimate=ce,
        )(x3, weight, bias)
        return out3.reshape(J * M, O)          # pure view, no transpose

    out2d = pl.pallas_call(
        _make_folded_kernel_slab(compute_dtype),
        out_shape=jax.ShapeDtypeStruct((M, J * O), out_dtype),
        compiler_params=params,
        cost_estimate=ce,
    )(x3, weight, bias)
    # (M, J*O) -> (J, M, O) -> (N, O): layout plumbing outside the kernel.
    return out2d.reshape(M, J, O).transpose(1, 0, 2).reshape(J * M, O)


# ---------------------------------------------------------------------------
# Path 2: tiled kernels (grid over J, M-tiles, N-tiles[, K-tiles]).
# ---------------------------------------------------------------------------
def _make_tiled_kernel_acc(compute_dtype):
    def kernel(x_ref, w_ref, b_ref, o_ref, acc_ref):
        # x (TM,TK)  w (TK,TN)  b (1,TN)  o/acc (TM,TN); K is grid axis 3.
        k = pl.program_id(3)

        @pl.when(k == 0)
        def _init():
            acc_ref[...] = jnp.zeros_like(acc_ref)

        x = x_ref[...]
        if compute_dtype is not None:
            x = x.astype(compute_dtype)
        acc_ref[...] += jnp.dot(x, w_ref[...],
                                preferred_element_type=jnp.float32)

        @pl.when(k == pl.num_programs(3) - 1)
        def _finalize():
            o_ref[...] = (acc_ref[...]
                          + b_ref[...].astype(jnp.float32)).astype(o_ref.dtype)
    return kernel


def _make_tiled_kernel_direct(compute_dtype):
    def kernel(x_ref, w_ref, b_ref, o_ref):
        # Single K step: no scratch accumulator, no VMEM read-modify-write.
        x = x_ref[...]
        if compute_dtype is not None:
            x = x.astype(compute_dtype)
        o_ref[...] = (jnp.dot(x, w_ref[...],
                              preferred_element_type=jnp.float32)
                      + b_ref[...].astype(jnp.float32)).astype(o_ref.dtype)
    return kernel


def _forward_tiled(x3, weight, bias, out_dtype, compute_dtype,
                   block_m, block_n, block_k, vmem_budget):
    J, M, I = x3.shape
    O = weight.shape[-1]
    x_item = jnp.dtype(x3.dtype).itemsize
    w_item = jnp.dtype(weight.dtype).itemsize
    b_item = jnp.dtype(bias.dtype).itemsize
    out_item = jnp.dtype(out_dtype).itemsize

    TM, TK, TN = _select_tiles(M, I, O, x_item, w_item, out_item, vmem_budget)
    # User overrides, clamped to aligned divisors (keeps the path pad-free).
    if block_n is not None:
        TN = _largest_divisor_tile(O, max(128, block_n), 128)
    if block_k is not None:
        TK = _largest_divisor_tile(I, max(128, block_k), 128)
    if block_m is not None:
        TM = _largest_divisor_tile(M, max(8, block_m), 8)

    gm, gn, gk = M // TM, O // TN, I // TK

    # v7x megacore: guarantee >=2 parallel grid slices so both TCs get work.
    if J * gm * gn == 1 and M >= 16 and M % 16 == 0:
        TM = M // 2
        gm = 2

    has_k = gk > 1
    x_bytes = J * M * I * x_item
    w_bytes = J * I * O * w_item
    if has_k:
        n_inner = True                       # traffic identical either way
    else:
        # Choose which operand gets re-streamed: keep the bigger one resident.
        n_inner = (x_bytes + gm * w_bytes) <= (gn * x_bytes + w_bytes)

    if has_k:
        if n_inner:
            grid = (J, gm, gn, gk)
            x_map = lambda j, m, n, k: (j, m, k)
            w_map = lambda j, m, n, k: (j, k, n)
            b_map = lambda j, m, n, k: (j, n)
            o_map = lambda j, m, n, k: (j, m, n)
        else:
            grid = (J, gn, gm, gk)
            x_map = lambda j, n, m, k: (j, m, k)
            w_map = lambda j, n, m, k: (j, k, n)
            b_map = lambda j, n, m, k: (j, n)
            o_map = lambda j, n, m, k: (j, m, n)
        kernel = _make_tiled_kernel_acc(compute_dtype)
        scratch = [pltpu.VMEM((TM, TN), jnp.float32)]
        semantics = ("parallel", "parallel", "parallel", "arbitrary")
    else:
        if n_inner:
            grid = (J, gm, gn)
            x_map = lambda j, m, n: (j, m, 0)
            w_map = lambda j, m, n: (j, 0, n)
            b_map = lambda j, m, n: (j, n)
            o_map = lambda j, m, n: (j, m, n)
        else:
            # m innermost: weight block index independent of m -> weight stays
            # resident in VMEM across all M tiles of a member (no re-DMA).
            grid = (J, gn, gm)
            x_map = lambda j, n, m: (j, m, 0)
            w_map = lambda j, n, m: (j, 0, n)
            b_map = lambda j, n, m: (j, n)
            o_map = lambda j, n, m: (j, m, n)
        kernel = _make_tiled_kernel_direct(compute_dtype)
        scratch = []
        semantics = ("parallel", "parallel", "parallel")

    # VMEM limit: double-buffered x/w/bias/out tiles (+ f32 acc) with headroom.
    est = (2 * TM * TK * x_item + 2 * TK * TN * w_item + 2 * TN * b_item
           + 2 * TM * TN * out_item + (TM * TN * 4 if has_k else 0))
    vmem_limit = int(min(max(2 * est, 32 * 2**20), vmem_budget))

    # Cost estimate including operand re-streaming across the tiled grid.
    w_reads = gm if (has_k or n_inner) else 1
    x_reads = gn if (has_k or not n_inner) else 1
    ce = pl.CostEstimate(
        flops=2 * J * M * I * O,
        transcendentals=0,
        bytes_accessed=(x_reads * x_bytes + w_reads * w_bytes
                        + bias.size * b_item + J * M * O * out_item))

    out3 = pl.pallas_call(
        kernel,
        out_shape=jax.ShapeDtypeStruct((J, M, O), out_dtype),
        grid_spec=pltpu.PrefetchScalarGridSpec(
            num_scalar_prefetch=0,
            grid=grid,
            in_specs=[
                pl.BlockSpec((pl.Squeezed(), TM, TK), x_map),
                pl.BlockSpec((pl.Squeezed(), TK, TN), w_map),
                pl.BlockSpec((1, TN), b_map),
            ],
            out_specs=pl.BlockSpec((pl.Squeezed(), TM, TN), o_map),
            scratch_shapes=scratch,
        ),
        compiler_params=pltpu.CompilerParams(
            dimension_semantics=semantics,
            vmem_limit_bytes=vmem_limit),
        cost_estimate=ce,
    )(x3, weight, bias)
    return out3.reshape(J * M, O)            # pure view, no transpose


# ---------------------------------------------------------------------------
# Public wrapper (matches EnsembleLinearLayer.forward semantics).
# ---------------------------------------------------------------------------
def ensemble_linear_forward(x, weight, bias=None, *, block_m=None,
                            block_n=None, block_k=None, compute_dtype=None):
    """
    x:      (N, I) with N % J == 0
    weight: (J, I, O)
    bias:   (J, O) or None (treated as zeros, mirroring bias=False)
    compute_dtype: optional dtype (e.g. jnp.bfloat16) used for the matmul
                   operands inside the kernel; accumulation stays float32.
                   Callers should pre-cast `weight` once and reuse it.
    returns (N, O) in x.dtype
    """
    N, I = x.shape
    J, I_w, O = weight.shape
    assert I == I_w, "in_features mismatch between x and weight"
    if N % J != 0:
        raise ValueError(
            f"Batch size of {N} is not compatible with {J} ensembles, "
            f"Batch size must be a multiple of ensemble size")
    M = N // J
    out_dtype = x.dtype
    if bias is None:
        bias = jnp.zeros((J, O), dtype=jnp.float32)

    x3 = x.reshape(J, M, I)                   # view, no data movement
    if compute_dtype is not None and weight.dtype != jnp.dtype(compute_dtype):
        # Fallback per-call cast; callers should pre-cast weights once outside
        # the forward and reuse them across calls to save an HBM pass.
        weight = weight.astype(compute_dtype)

    vmem_budget = _vmem_budget_bytes()

    x_item = jnp.dtype(x3.dtype).itemsize
    w_item = jnp.dtype(weight.dtype).itemsize
    out_item = jnp.dtype(out_dtype).itemsize
    total_bytes = (x3.size * x_item + weight.size * w_item
                   + bias.size * jnp.dtype(bias.dtype).itemsize
                   + J * M * O * out_item + M * O * 4)
    use_folded = (block_m is None and block_n is None and block_k is None
                  and J <= 16 and total_bytes <= 8 * 2**20)
    if use_folded:
        return _forward_folded(x3, weight, bias, out_dtype, compute_dtype,
                               vmem_budget)
    return _forward_tiled(x3, weight, bias, out_dtype, compute_dtype,
                          block_m, block_n, block_k, vmem_budget)


def init_params(key, in_features, out_features, ensemble_size):
    """Deterministic init mirroring PyTorch reset_parameters shapes/bounds."""
    kw, kb = jax.random.split(key)
    fan_in = in_features * out_features
    bound = 1.0 / math.sqrt(fan_in) if fan_in > 0 else 0.0
    weight = jax.random.uniform(
        kw, (ensemble_size, in_features, out_features),
        minval=-bound, maxval=bound, dtype=jnp.float32)
    bias = jax.random.uniform(
        kb, (ensemble_size, out_features),
        minval=-bound, maxval=bound, dtype=jnp.float32)
    return weight, bias


if __name__ == "__main__":
    key = jax.random.PRNGKey(0)
    ks = jax.random.split(key, 8)

    def ref_fwd(x, w, b):
        J, I, O = w.shape
        M = x.shape[0] // J
        return (jnp.einsum("jmi,jio->jmo",
                           x.reshape(J, M, I).astype(jnp.float32),
                           w.astype(jnp.float32))
                + b[:, None, :]).reshape(x.shape[0], O)

    # --- Test 1: folded path, wide O (per-member (J,M,O) stores) ------------
    J, M, I, O = 4, 8, 32, 128
    w, b = init_params(ks[0], I, O, J)
    x = jax.random.normal(ks[1], (J * M, I), dtype=jnp.float32)
    out = jax.block_until_ready(ensemble_linear_forward(x, w, b))
    assert out.shape == (J * M, O)
    assert jnp.allclose(out, ref_fwd(x, w, b), atol=1e-5, rtol=1e-5), \
        "folded wide-O mismatch"

    # --- Test 2: folded path, narrow O (<128 -> lane-dense slab) ------------
    J, M, I, O = 4, 8, 32, 32
    w, b = init_params(ks[2], I, O, J)
    x = jax.random.normal(ks[3], (J * M, I), dtype=jnp.float32)
    out = jax.block_until_ready(ensemble_linear_forward(x, w, b))
    assert jnp.allclose(out, ref_fwd(x, w, b), atol=1e-5, rtol=1e-5), \
        "folded narrow-O mismatch"

    # --- Test 3: tiled path with K accumulation (block_k splits I) ----------
    J, M, I, O = 2, 16, 256, 128
    w, b = init_params(ks[4], I, O, J)
    x = jax.random.normal(ks[5], (J * M, I), dtype=jnp.float32)
    out = jax.block_until_ready(
        ensemble_linear_forward(x, w, b, block_m=8, block_k=128, block_n=128))
    assert jnp.allclose(out, ref_fwd(x, w, b), atol=1e-4, rtol=1e-4), \
        "tiled K-accum mismatch"

    # --- Test 4: tiled path, single K step, N tiled (weight resident) -------
    J, M, I, O = 2, 16, 128, 256
    w, b = init_params(ks[6], I, O, J)
    x = jax.random.normal(ks[7], (J * M, I), dtype=jnp.float32)
    out = jax.block_until_ready(
        ensemble_linear_forward(x, w, b, block_m=8, block_n=128))
    assert jnp.allclose(out, ref_fwd(x, w, b), atol=1e-4, rtol=1e-4), \
        "tiled direct mismatch"

    # --- Test 5: bf16 compute operands, f32 accumulation ---------------------
    out_bf16 = jax.block_until_ready(
        ensemble_linear_forward(x, w, b, compute_dtype=jnp.bfloat16))
    assert jnp.allclose(out_bf16, ref_fwd(x, w, b), atol=5e-2, rtol=5e-2), \
        "bf16 mismatch"

    print("KERNEL_OK")
</pallas_src>

<mosaic_0001>
module attributes {stable_mosaic.version = 11 : i64} {
  func.func @kernel(%arg0: memref<4x8x32xf32, #tpu.memory_space<vmem>>, %arg1: memref<4x32x128xf32, #tpu.memory_space<vmem>>, %arg2: memref<4x128xf32, #tpu.memory_space<vmem>>, %arg3: memref<4x8x128xf32, #tpu.memory_space<vmem>>) attributes {dimension_semantics = [], scalar_prefetch = 0 : i64, scratch_operands = 0 : i64, tpu.core_type = #tpu.core_type<tc>} {
    %c0 = arith.constant 0 : index
    %c0_0 = arith.constant 0 : index
    %c0_1 = arith.constant 0 : index
    %0 = vector.load %arg0[%c0, %c0_0, %c0_1] : memref<4x8x32xf32, #tpu.memory_space<vmem>>, vector<1x8x32xf32>
    %1 = vector.shape_cast %0 : vector<1x8x32xf32> to vector<8x32xf32>
    %c0_2 = arith.constant 0 : index
    %c0_3 = arith.constant 0 : index
    %c0_4 = arith.constant 0 : index
    %2 = vector.load %arg1[%c0_2, %c0_3, %c0_4] : memref<4x32x128xf32, #tpu.memory_space<vmem>>, vector<1x32x128xf32>
    %3 = vector.shape_cast %2 : vector<1x32x128xf32> to vector<32x128xf32>
    %cst = arith.constant dense<0.000000e+00> : vector<8x128xf32>
    %4 = tpu.matmul %1, %3, %cst {dimension_numbers = #tpu.dot_dimension_numbers<[1], [0], [0], [1], [0, 0, 1, 1], [], []>} : vector<8x32xf32>, vector<32x128xf32>, vector<8x128xf32> -> vector<8x128xf32>
    %c0_5 = arith.constant 0 : index
    %c0_6 = arith.constant 0 : index
    %5 = vector.load %arg2[%c0_5, %c0_6] : memref<4x128xf32, #tpu.memory_space<vmem>>, vector<1x128xf32>
    %6 = vector.broadcast %5 : vector<1x128xf32> to vector<8x128xf32>
    %7 = arith.addf %4, %6 : vector<8x128xf32>
    %c0_7 = arith.constant 0 : index
    %c0_8 = arith.constant 0 : index
    %c0_9 = arith.constant 0 : index
    %8 = vector.load %arg3[%c0_7, %c0_8, %c0_9] : memref<4x8x128xf32, #tpu.memory_space<vmem>>, vector<1x8x128xf32>
    %9 = vector.shape_cast %8 : vector<1x8x128xf32> to vector<8x128xf32>
    %10 = vector.shape_cast %7 : vector<8x128xf32> to vector<1x8x128xf32>
    tpu.vector_store %arg3[%c0_7, %c0_8, %c0_9], %10 {strides = array<i32>} : memref<4x8x128xf32, #tpu.memory_space<vmem>>, vector<1x8x128xf32>,
    %c1 = arith.constant 1 : index
    %c0_10 = arith.constant 0 : index
    %c0_11 = arith.constant 0 : index
    %11 = vector.load %arg0[%c1, %c0_10, %c0_11] : memref<4x8x32xf32, #tpu.memory_space<vmem>>, vector<1x8x32xf32>
    %12 = vector.shape_cast %11 : vector<1x8x32xf32> to vector<8x32xf32>
    %c1_12 = arith.constant 1 : index
    %c0_13 = arith.constant 0 : index
    %c0_14 = arith.constant 0 : index
    %13 = vector.load %arg1[%c1_12, %c0_13, %c0_14] : memref<4x32x128xf32, #tpu.memory_space<vmem>>, vector<1x32x128xf32>
    %14 = vector.shape_cast %13 : vector<1x32x128xf32> to vector<32x128xf32>
    %cst_15 = arith.constant dense<0.000000e+00> : vector<8x128xf32>
    %15 = tpu.matmul %12, %14, %cst_15 {dimension_numbers = #tpu.dot_dimension_numbers<[1], [0], [0], [1], [0, 0, 1, 1], [], []>} : vector<8x32xf32>, vector<32x128xf32>, vector<8x128xf32> -> vector<8x128xf32>
    %c1_16 = arith.constant 1 : index
    %c0_17 = arith.constant 0 : index
    %16 = vector.load %arg2[%c1_16, %c0_17] : memref<4x128xf32, #tpu.memory_space<vmem>>, vector<1x128xf32>
    %17 = vector.broadcast %16 : vector<1x128xf32> to vector<8x128xf32>
    %18 = arith.addf %15, %17 : vector<8x128xf32>
    %c1_18 = arith.constant 1 : index
    %c0_19 = arith.constant 0 : index
    %c0_20 = arith.constant 0 : index
    %19 = vector.load %arg3[%c1_18, %c0_19, %c0_20] : memref<4x8x128xf32, #tpu.memory_space<vmem>>, vector<1x8x128xf32>
    %20 = vector.shape_cast %19 : vector<1x8x128xf32> to vector<8x128xf32>
    %21 = vector.shape_cast %18 : vector<8x128xf32> to vector<1x8x128xf32>
    tpu.vector_store %arg3[%c1_18, %c0_19, %c0_20], %21 {strides = array<i32>} : memref<4x8x128xf32, #tpu.memory_space<vmem>>, vector<1x8x128xf32>,
    %c2 = arith.constant 2 : index
    %c0_21 = arith.constant 0 : index
    %c0_22 = arith.constant 0 : index
    %22 = vector.load %arg0[%c2, %c0_21, %c0_22] : memref<4x8x32xf32, #tpu.memory_space<vmem>>, vector<1x8x32xf32>
    %23 = vector.shape_cast %22 : vector<1x8x32xf32> to vector<8x32xf32>
    %c2_23 = arith.constant 2 : index
    %c0_24 = arith.constant 0 : index
    %c0_25 = arith.constant 0 : index
    %24 = vector.load %arg1[%c2_23, %c0_24, %c0_25] : memref<4x32x128xf32, #tpu.memory_space<vmem>>, vector<1x32x128xf32>
    %25 = vector.shape_cast %24 : vector<1x32x128xf32> to vector<32x128xf32>
    %cst_26 = arith.constant dense<0.000000e+00> : vector<8x128xf32>
    %26 = tpu.matmul %23, %25, %cst_26 {dimension_numbers = #tpu.dot_dimension_numbers<[1], [0], [0], [1], [0, 0, 1, 1], [], []>} : vector<8x32xf32>, vector<32x128xf32>, vector<8x128xf32> -> vector<8x128xf32>
    %c2_27 = arith.constant 2 : index
    %c0_28 = arith.constant 0 : index
    %27 = vector.load %arg2[%c2_27, %c0_28] : memref<4x128xf32, #tpu.memory_space<vmem>>, vector<1x128xf32>
    %28 = vector.broadcast %27 : vector<1x128xf32> to vector<8x128xf32>
    %29 = arith.addf %26, %28 : vector<8x128xf32>
    %c2_29 = arith.constant 2 : index
    %c0_30 = arith.constant 0 : index
    %c0_31 = arith.constant 0 : index
    %30 = vector.load %arg3[%c2_29, %c0_30, %c0_31] : memref<4x8x128xf32, #tpu.memory_space<vmem>>, vector<1x8x128xf32>
    %31 = vector.shape_cast %30 : vector<1x8x128xf32> to vector<8x128xf32>
    %32 = vector.shape_cast %29 : vector<8x128xf32> to vector<1x8x128xf32>
    tpu.vector_store %arg3[%c2_29, %c0_30, %c0_31], %32 {strides = array<i32>} : memref<4x8x128xf32, #tpu.memory_space<vmem>>, vector<1x8x128xf32>,
    %c3 = arith.constant 3 : index
    %c0_32 = arith.constant 0 : index
    %c0_33 = arith.constant 0 : index
    %33 = vector.load %arg0[%c3, %c0_32, %c0_33] : memref<4x8x32xf32, #tpu.memory_space<vmem>>, vector<1x8x32xf32>
    %34 = vector.shape_cast %33 : vector<1x8x32xf32> to vector<8x32xf32>
    %c3_34 = arith.constant 3 : index
    %c0_35 = arith.constant 0 : index
    %c0_36 = arith.constant 0 : index
    %35 = vector.load %arg1[%c3_34, %c0_35, %c0_36] : memref<4x32x128xf32, #tpu.memory_space<vmem>>, vector<1x32x128xf32>
    %36 = vector.shape_cast %35 : vector<1x32x128xf32> to vector<32x128xf32>
    %cst_37 = arith.constant dense<0.000000e+00> : vector<8x128xf32>
    %37 = tpu.matmul %34, %36, %cst_37 {dimension_numbers = #tpu.dot_dimension_numbers<[1], [0], [0], [1], [0, 0, 1, 1], [], []>} : vector<8x32xf32>, vector<32x128xf32>, vector<8x128xf32> -> vector<8x128xf32>
    %c3_38 = arith.constant 3 : index
    %c0_39 = arith.constant 0 : index
    %38 = vector.load %arg2[%c3_38, %c0_39] : memref<4x128xf32, #tpu.memory_space<vmem>>, vector<1x128xf32>
    %39 = vector.broadcast %38 : vector<1x128xf32> to vector<8x128xf32>
    %40 = arith.addf %37, %39 : vector<8x128xf32>
    %c3_40 = arith.constant 3 : index
    %c0_41 = arith.constant 0 : index
    %c0_42 = arith.constant 0 : index
    %41 = vector.load %arg3[%c3_40, %c0_41, %c0_42] : memref<4x8x128xf32, #tpu.memory_space<vmem>>, vector<1x8x128xf32>
    %42 = vector.shape_cast %41 : vector<1x8x128xf32> to vector<8x128xf32>
    %43 = vector.shape_cast %40 : vector<8x128xf32> to vector<1x8x128xf32>
    tpu.vector_store %arg3[%c3_40, %c0_41, %c0_42], %43 {strides = array<i32>} : memref<4x8x128xf32, #tpu.memory_space<vmem>>, vector<1x8x128xf32>,
    return
  }
}

</mosaic_0001>

<bundles_post_ra>
// kernel: tpu_custom_call.1
= control target key start
LH: loop header
LB: loop body
LE: loop exit
PB: predicated region body
PF: predicated region fallthrough
CT: control target
= control target key end

     0   :  { %8 = vsyncpa [#allocation3], 0  ;;  %s676_s0 = inlined_call_operand.hbm [shape: f32[4,8,32], index: 0, kind: input, shape index: {}]   ;;  %s677_s1 = inlined_call_operand.hbm [shape: f32[4,32,128], index: 1, kind: input, shape index: {}]   ;;  %s678_s2 = inlined_call_operand.vmem [shape: f32[4,128], index: 2, kind: input, shape index: {}]   ;;  %s679_s3 = inlined_call_operand.hbm [shape: f32[4,8,128], index: 3, kind: output, shape index: {}]  }
   0x1   :  { %9 = vsyncpa [#allocation6], 0 }
   0x2   :  { %10 = vsyncpa [#allocation4], 0  ;;  %s583_s12 = smov [#allocation2]   ;;  %s511_s16 = scalar_lea.hbm %s676_s0, 512 }
   0x3   :  { %s16_s13 = sshll.u32 %s583_s12, 4  ;;  %p512_p0 = scmp.ne.s32.totalorder %s676_s0, %s511_s16  ;;  %s17_s13 = int_to_ptr.vmem [resolvable:$true] %s16_s13 }
   0x4   :  { %p515_p1 = scmp.lt.u32.totalorder %s511_s16, %s676_s0 }
   0x6   :  { %p517_p2 = pnand %p515_p1, %p512_p0 }
   0x8   :  { %520 = shalt.err (!%p517_p2)
}
   0x9   :  { %s521_s21 = scalar_lea.vmem %s17_s13, 512  ;;  %p526_p4 = scmp.lt.s32.totalorder %s17_s13, %s17_s13 }
   0xa   :  { %p522_p3 = scmp.ne.s32.totalorder %s17_s13, %s521_s21  ;;  %p527_p5 = scmp.lt.s32.totalorder %s521_s21, %s521_s21 }
   0xc   :  { %p528_p6 = por %p527_p5, %p526_p4 }
   0xe   :  { %p529_p7 = pnand %p528_p6, %p522_p3 }
  0x10   :  { %532 = shalt.err (!%p529_p7)
}
  0x11   :  { %s584_s22 = smov 128   ;;  %s585_s23 = smov 8  }
  0x12   :  { %22 = dma.hbm_to_vmem [thread:$0]  %s676_s0, 512, %s17_s13, [#allocation3], %s584_s22, %s584_s22, %s585_s23  }
  0x13   :  { %s586_s26 = smov [#allocation5]   ;;  %s533_s30 = scalar_lea.hbm %s677_s1, 2048 }
  0x14   :  { %s28_s27 = sshll.u32 %s586_s26, 4  ;;  %p534_p8 = scmp.ne.s32.totalorder %s677_s1, %s533_s30  ;;  %s29_s27 = int_to_ptr.vmem [resolvable:$true] %s28_s27 }
  0x15   :  { %p537_p9 = scmp.lt.u32.totalorder %s533_s30, %s677_s1 }
  0x17   :  { %p539_p10 = pnand %p537_p9, %p534_p8 }
  0x19   :  { %542 = shalt.err (!%p539_p10)
}
  0x1a   :  { %s543_s8 = scalar_lea.vmem %s29_s27, 2048  ;;  %p548_p12 = scmp.lt.s32.totalorder %s29_s27, %s29_s27 }
  0x1b   :  { %p544_p11 = scmp.ne.s32.totalorder %s29_s27, %s543_s8  ;;  %p549_p13 = scmp.lt.s32.totalorder %s543_s8, %s543_s8 }
  0x1d   :  { %p550_p0 = por %p549_p13, %p548_p12 }
  0x1f   :  { %p551_p1 = pnand %p550_p0, %p544_p11 }
  0x21   :  { %554 = shalt.err (!%p551_p1)
}
  0x22   :  { %34 = dma.hbm_to_vmem [thread:$0]  %s677_s1, 2048, %s29_s27, [#allocation6], %s584_s22, %s584_s22, %s585_s23  }
  0x23   :  { %577 = dma.done.wait [#allocation3], 512  }
  0x24   :  { %578 = vsyncadd [#allocation3], 4294966784 }
  0x25   :  { %579 = dma.done.wait [#allocation6], 2048  }
  0x26   :  { %580 = vsyncadd [#allocation6], 4294965248  ;;  %v587_v0 = vmov 0.0|0.0   ;;  %vm588_vm0 = vmmov 0   ;;  %v589_v1 = vmov 0.0   ;;  %v44_v2 = vld [vmem:[#allocation5] sm:$0xff] }
  0x27   :  { %479 = vmatprep.subr.bf16.mxu0 %v587_v0  ;;  %485 = vmatprep.subr.bf16.mxu1 %v587_v0  ;;  %v45_v3 = vld [vmem:[#allocation5 + $0x8] sm:$0xff]  ;;  %v131_v4 = vld [vmem:[#allocation5 + $0x20] sm:$0xff]  ;;  %v46_v7 = vld [vmem:[#allocation5 + $0x10] sm:$0xff]  ;;  %vm53_vm1 = vcmask 261120   ;;  %s590_s17 = smov [#allocation7]  }
  0x28   :  { %443 = vmatprep.mubr.msk.f32.mxu0 %vm588_vm0, %v589_v1  ;;  %454 = vmatprep.mubr.msk.f32.mxu1 %vm588_vm0, %v589_v1  ;;  %v480_v5 = vpack.c.bf16 %v45_v3, %v44_v2  ;;  %v132_v6 = vld [vmem:[#allocation5 + $0x28] sm:$0xff]  ;;  %v47_v8 = vld [vmem:[#allocation5 + $0x18] sm:$0xff]  ;;  %v133_v10 = vld [vmem:[#allocation5 + $0x30] sm:$0xff]  ;;  %s394_s18 = sshll.u32 %s590_s17, 4  ;;  %s395_s18 = int_to_ptr.vmem [resolvable:$true] %s394_s18 }
  0x29   :  { %v486_v9 = vpack.c.bf16 %v132_v6, %v131_v4  ;;  %v134_v11 = vld [vmem:[#allocation5 + $0x38] sm:$0xff]  ;;  %v483_v12 = vpack.c.bf16 %v47_v8, %v46_v7  ;;  %v218_v14 = vld [vmem:[#allocation5 + $0x40] sm:$0xff]  ;;  %v219_v15 = vld [vmem:[#allocation5 + $0x48] sm:$0xff]  ;;  %s555_s19 = scalar_lea.vmem %s395_s18, 512  ;;  %p560_p3 = scmp.lt.s32.totalorder %s395_s18, %s395_s18 }
  0x2a   :  { %481 = vmatpush3.bf16.msra.mxu0 %v480_v5  ;;  %v489_v13 = vpack.c.bf16 %v134_v11, %v133_v10  ;;  %v305_v16 = vld [vmem:[#allocation5 + $0x60] sm:$0xff]  ;;  %v306_v17 = vld [vmem:[#allocation5 + $0x68] sm:$0xff]  ;;  %v492_v19 = vpack.c.bf16 %v219_v15, %v218_v14  ;;  %v220_v22 = vld [vmem:[#allocation5 + $0x50] sm:$0xff]  ;;  %p556_p2 = scmp.ne.s32.totalorder %s395_s18, %s555_s19  ;;  %p561_p4 = scmp.lt.s32.totalorder %s555_s19, %s555_s19 }
  0x2b   :  { %487 = vmatpush3.bf16.msra.mxu1 %v486_v9  ;;  %482 = vmatprep.subr.bf16.mxu0 %v587_v0  ;;  %v43_v18 = vld [vmem:[#allocation2] sm:$0xff]  ;;  %v129_v20 = vld [vmem:[#allocation2 + $0x8] sm:$0xff]  ;;  %v498_v21 = vpack.c.bf16 %v306_v17, %v305_v16  ;;  %v221_v23 = vld [vmem:[#allocation5 + $0x58] sm:$0xff] }
  0x2c   :  { %488 = vmatprep.subr.bf16.mxu1 %v587_v0  ;;  %v307_v24 = vld [vmem:[#allocation5 + $0x70] sm:$0xff]  ;;  %v308_v25 = vld [vmem:[#allocation5 + $0x78] sm:$0xff]  ;;  %v495_v26 = vpack.c.bf16 %v221_v23, %v220_v22  ;;  %v407_v30 = vld [vmem:[%s678_s2] ss:$0 sm:$0xff]  ;;  %p562_p5 = por %p561_p4, %p560_p3 }
  0x2d   :  { %v501_v27 = vpack.c.bf16 %v308_v25, %v307_v24  ;;  %v216_v28 = vld [vmem:[#allocation2 + $0x10] sm:$0xff]  ;;  %v303_v29 = vld [vmem:[#allocation2 + $0x18] sm:$0xff]  ;;  %v409_v31 = vld [vmem:[%s678_s2 + $0x1] ss:$0 sm:$0xff] }
  0x2e   :  { %484 = vmatpush3.bf16.msra.mxu0 %v483_v12  ;;  %v411_v38 = vld [vmem:[%s678_s2 + $0x2] ss:$0 sm:$0xff]  ;;  %v413_v39 = vld [vmem:[%s678_s2 + $0x3] ss:$0 sm:$0xff]  ;;  %p563_p6 = pnand %p562_p5, %p556_p2 }
  0x2f   :  { %490 = vmatpush3.bf16.msra.mxu1 %v489_v13  ;;  %491 = vmatprep.subr.bf16.mxu0 %v587_v0 }
  0x30   :  { %497 = vmatprep.subr.bf16.mxu1 %v587_v0 }
  0x31   :  { %444 = vmatmul.mubr.msk.f32.vlgmr.msra.gmra.mrb[0].mxu0 %vm53_vm1, %v43_v18 }
  0x32   :  { %455 = vmatmul.mubr.msk.f32.vlgmr.msra.gmra.mrb[0].mxu1 %vm53_vm1, %v129_v20  ;;  %493 = vmatpush3.bf16.msra.mxu0 %v492_v19 }
  0x33   :  { %499 = vmatpush3.bf16.msra.mxu1 %v498_v21  ;;  %494 = vmatprep.subr.bf16.mxu0 %v587_v0 }
  0x34   :  { %500 = vmatprep.subr.bf16.mxu1 %v587_v0  ;;  %465 = vmatprep.mubr.msk.f32.mxu0 %vm588_vm0, %v589_v1 }
  0x35   :  { %476 = vmatprep.mubr.msk.f32.mxu1 %vm588_vm0, %v589_v1 }
  0x36   :  { %496 = vmatpush3.bf16.msra.mxu0 %v495_v26 }
  0x37   :  { %502 = vmatpush3.bf16.msra.mxu1 %v501_v27 }
  0x39   :  { %466 = vmatmul.mubr.msk.f32.vlgmr.msra.gmra.mrb[2].mxu0 %vm53_vm1, %v216_v28 }
  0x3a   :  { %477 = vmatmul.mubr.msk.f32.vlgmr.msra.gmra.mrb[2].mxu1 %vm53_vm1, %v303_v29 }
 0x104   :  { %v123_v32 = vpop.f32.mrb[0].mxu0 }
 0x105   :  { %v124_v33 = vadd.f32 %v407_v30, %v123_v32  ;;  %v209_v34 = vpop.f32.mrb[0].mxu1  ;;  %v445_v35 = vpop.f32.mrb[1].mxu0 }
 0x106   :  { %v210_v36 = vadd.f32 %v409_v31, %v209_v34  ;;  %v456_v37 = vpop.f32.mrb[1].mxu1 }
 0x107   :  { %127 = vst [vmem:[#allocation7] sm:$0xff] %v124_v33 }
 0x108   :  { %214 = vst [vmem:[#allocation7 + $0x8] sm:$0xff] %v210_v36 }
 0x10c   :  { %v296_v40 = vpop.f32.mrb[2].mxu0 }
 0x10d   :  { %v297_v41 = vadd.f32 %v411_v38, %v296_v40  ;;  %v383_v42 = vpop.f32.mrb[2].mxu1  ;;  %v467_v43 = vpop.f32.mrb[3].mxu0 }
 0x10e   :  { %v384_v44 = vadd.f32 %v413_v39, %v383_v42  ;;  %v478_v45 = vpop.f32.mrb[3].mxu1 }
 0x10f   :  { %301 = vst [vmem:[#allocation7 + $0x10] sm:$0xff] %v297_v41 }
 0x110   :  { %388 = vst [vmem:[#allocation7 + $0x18] sm:$0xff] %v384_v44 }
 0x111   :  { %566 = shalt.err (!%p563_p6)
}
 0x112   :  { %s567_s21 = scalar_lea.hbm %s679_s3, 512 }
 0x113   :  { %p568_p7 = scmp.ne.s32.totalorder %s679_s3, %s567_s21  ;;  %p571_p8 = scmp.lt.u32.totalorder %s567_s21, %s679_s3 }
 0x115   :  { %p573_p9 = pnand %p571_p8, %p568_p7 }
 0x117   :  { %576 = shalt.err (!%p573_p9)
}
 0x118   :  { %400 = dma.vmem_to_hbm [thread:$0]  %s395_s18, 512, %s679_s3, [#allocation4], %s584_s22, %s584_s22, %s585_s23  }
 0x119   :  { %581 = dma.done.wait [#allocation4], 512  }
 0x11a   :  { %582 = vsyncadd [#allocation4], 4294966784 }
 0x11b   :  { %404 = vsyncpa [#allocation3], 1 }
 0x11c   :  { %405 = vsyncpa [#allocation6], 1 }
 0x11d   :  { %406 = vsyncpa [#allocation4], 1 }

</bundles_post_ra>
